<compile_context>
chip_gen: v7x
topology: tpu7x:2x2x1
jax: 0.10.0
libtpu: 0.0.40
codegen_flags: <defaults>
</compile_context>

<pallas_src>
import functools

import jax
import jax.numpy as jnp
from jax import lax
from jax.experimental import pallas as pl
from jax.experimental.pallas import tpu as pltpu


def _round_up(x, m):
    return ((x + m - 1) // m) * m


def _transe_kernel(emb_t_ref, delta_ref, d_sq_ref, out_ref, e_sq_ref):
    # emb_t_ref: (D, te)   K-major entity tile (matmul dtype, e.g. bf16)
    # delta_ref: (tb, D)   folded (rel - ctx) / -(ctx + rel) tile (matmul dtype)
    # d_sq_ref:  (tb, 1)   f32 ||delta||^2 (precomputed, tiny)
    # out_ref:   (tb, te)  scores
    # e_sq_ref:  (1, te)   f32 VMEM scratch: ||emb||^2, computed once per entity tile
    #                      and reused across the whole inner batch sweep.
    @pl.when(pl.program_id(1) == 0)
    def _():
        e = emb_t_ref[...].astype(jnp.float32)
        e_sq_ref[...] = jnp.sum(e * e, axis=0, keepdims=True)

    # cross[i, j] = sum_k delta[i, k] * emb_t[k, j] -- MXU, f32 accumulation.
    cross = lax.dot_general(
        delta_ref[...], emb_t_ref[...],
        dimension_numbers=(((1,), (0,)), ((), ())),
        preferred_element_type=jnp.float32,
    )                                                     # (tb, te) f32
    sq_dist = d_sq_ref[...] + e_sq_ref[...] + 2.0 * cross  # VPU broadcast-adds
    out_ref[...] = jnp.sqrt(jnp.maximum(sq_dist, 0.0)).astype(out_ref.dtype)


@functools.partial(jax.jit,
                   static_argnames=("tb", "te", "matmul_dtype", "out_dtype"))
def transe_forward(ctx_out, rel_out, emb_ent, *, tb=512, te=2048,
                   matmul_dtype=jnp.bfloat16, out_dtype=None):
    B, D = ctx_out.shape
    E, _ = emb_ent.shape
    half = B // 2

    if matmul_dtype is None:
        matmul_dtype = ctx_out.dtype
    if out_dtype is None:
        out_dtype = ctx_out.dtype

    # ---- O(B*D) prep in plain JAX (tiny vs. the O(B*E*D) kernel) ----
    ctx_f32 = ctx_out.astype(jnp.float32)
    rel_f32 = rel_out.astype(jnp.float32)
    delta = jnp.concatenate(
        [rel_f32[:half] - ctx_f32[:half],          # emb + rel - tail
         -(ctx_f32[half:] + rel_f32[half:])],      # head + rel - emb (negated; norm-invariant)
        axis=0,
    )                                               # (B, D) f32
    d_sq = jnp.sum(delta * delta, axis=-1, keepdims=True)   # (B, 1) f32

    delta_mm = delta.astype(matmul_dtype)                    # (B, D)
    emb_t_mm = emb_ent.astype(matmul_dtype).T                # (D, E) K-major for the MXU

    # ---- tiling (pad B / E so any shape works; padded rows/cols are sliced off) ----
    tb_eff = min(tb, _round_up(B, 8))
    te_eff = min(te, _round_up(E, 128))
    B_pad = _round_up(B, tb_eff)
    E_pad = _round_up(E, te_eff)
    if B_pad != B:
        delta_mm = jnp.pad(delta_mm, ((0, B_pad - B), (0, 0)))
        d_sq = jnp.pad(d_sq, ((0, B_pad - B), (0, 0)))
    if E_pad != E:
        emb_t_mm = jnp.pad(emb_t_mm, ((0, 0), (0, E_pad - E)))

    # Entity axis OUTER (emb tile + its fused e_sq are streamed once); batch axis inner.
    grid = (E_pad // te_eff, B_pad // tb_eff)

    mm_item = jnp.dtype(matmul_dtype).itemsize
    out_item = jnp.dtype(out_dtype).itemsize
    est_bytes = (2 * (D * te_eff * mm_item)            # emb tile, double-buffered
                 + 2 * (tb_eff * D * mm_item)          # delta tile
                 + 2 * (tb_eff * 4)                    # d_sq tile
                 + 2 * (tb_eff * te_eff * out_item)    # output tile
                 + te_eff * 4)                         # e_sq scratch
    # Floor 32 MiB (v5e scoped default is 16 MiB), cap 48 MiB (v7x has 64 MiB/TC).
    vmem_limit = int(min(max(int(est_bytes * 1.5), 32 * 1024 * 1024),
                         48 * 1024 * 1024))

    cost = pl.CostEstimate(
        flops=2 * B_pad * E_pad * D,
        transcendentals=B_pad * E_pad,                 # one sqrt per output element
        bytes_accessed=(E_pad * D * mm_item + B_pad * D * mm_item
                        + B_pad * 4 + B_pad * E_pad * out_item),
    )

    score = pl.pallas_call(
        _transe_kernel,
        out_shape=jax.ShapeDtypeStruct((B_pad, E_pad), out_dtype),
        grid_spec=pltpu.PrefetchScalarGridSpec(
            num_scalar_prefetch=0,
            grid=grid,
            in_specs=[
                pl.BlockSpec((D, te_eff), lambda j, i: (0, j)),   # K-major emb tile
                pl.BlockSpec((tb_eff, D), lambda j, i: (i, 0)),   # delta tile
                pl.BlockSpec((tb_eff, 1), lambda j, i: (i, 0)),   # ||delta||^2 tile
            ],
            out_specs=pl.BlockSpec((tb_eff, te_eff), lambda j, i: (i, j)),
            scratch_shapes=[pltpu.VMEM((1, te_eff), jnp.float32)],
        ),
        compiler_params=pltpu.CompilerParams(
            # entity axis parallel (v7x megacore split lands on entities),
            # batch axis arbitrary (e_sq scratch carried across the inner sweep).
            dimension_semantics=("parallel", "arbitrary"),
            vmem_limit_bytes=vmem_limit,
        ),
        cost_estimate=cost,
    )(emb_t_mm, delta_mm, d_sq)

    return score[:B, :E]


def transe_reference(ctx_out, rel_out, emb_ent):
    """Pure-JAX mirror of the PyTorch forward (for verification)."""
    B = ctx_out.shape[0]
    half = B // 2
    rel_1, rel_2 = rel_out[:half, None, :], rel_out[half:, None, :]
    tail, head = ctx_out[:half, None, :], ctx_out[half:, None, :]
    emb = emb_ent[None, :, :]
    s1 = jnp.linalg.norm(emb + rel_1 - tail, ord=2, axis=-1)
    s2 = jnp.linalg.norm(head + rel_2 - emb, ord=2, axis=-1)
    return jnp.concatenate([s1, s2], axis=0)


if __name__ == "__main__":
    key = jax.random.PRNGKey(0)
    k1, k2, k3 = jax.random.split(key, 3)

    # Small deterministic shapes consistent with the module:
    # batch=8 (half=4), hidden dim=128, num entities=256.
    B, D, E = 8, 128, 256
    ctx_out = jax.random.normal(k1, (B, D), dtype=jnp.float32)
    rel_out = jax.random.normal(k2, (B, D), dtype=jnp.float32)
    emb_ent = jax.random.normal(k3, (E, D), dtype=jnp.float32)

    ref = transe_reference(ctx_out, rel_out, emb_ent)

    # 1) Exact path: f32 MXU matmul, f32 output -> tight tolerance.
    score_exact = jax.block_until_ready(
        transe_forward(ctx_out, rel_out, emb_ent, matmul_dtype=jnp.float32))
    assert score_exact.shape == (B, E), score_exact.shape
    assert jnp.allclose(score_exact, ref, atol=1e-3, rtol=1e-3), (
        float(jnp.max(jnp.abs(score_exact - ref))))

    # 2) Default fast path: bf16 MXU inputs (f32 accumulate), f32 output.
    score_fast = jax.block_until_ready(transe_forward(ctx_out, rel_out, emb_ent))
    assert jnp.allclose(score_fast, ref, atol=2e-2, rtol=2e-2), (
        float(jnp.max(jnp.abs(score_fast - ref))))

    # 3) Throughput config: bf16 output (halves the dominant HBM writeback stream).
    score_bf16 = jax.block_until_ready(
        transe_forward(ctx_out, rel_out, emb_ent, out_dtype=jnp.bfloat16))
    assert score_bf16.dtype == jnp.bfloat16
    assert jnp.allclose(score_bf16.astype(jnp.float32), ref, atol=2e-1, rtol=2e-2), (
        float(jnp.max(jnp.abs(score_bf16.astype(jnp.float32) - ref))))

    # 4) Padding path: non-tile-multiple batch / entity counts (exercises B/E padding).
    Bo, Do, Eo = 6, 64, 200
    ko1, ko2, ko3 = jax.random.split(jax.random.PRNGKey(1), 3)
    ctx_o = jax.random.normal(ko1, (Bo, Do), dtype=jnp.float32)
    rel_o = jax.random.normal(ko2, (Bo, Do), dtype=jnp.float32)
    emb_o = jax.random.normal(ko3, (Eo, Do), dtype=jnp.float32)
    score_o = jax.block_until_ready(
        transe_forward(ctx_o, rel_o, emb_o, matmul_dtype=jnp.float32))
    ref_o = transe_reference(ctx_o, rel_o, emb_o)
    assert score_o.shape == (Bo, Eo), score_o.shape
    assert jnp.allclose(score_o, ref_o, atol=1e-3, rtol=1e-3), (
        float(jnp.max(jnp.abs(score_o - ref_o))))

    print("KERNEL_OK")
</pallas_src>

<mosaic_0001>
module attributes {stable_mosaic.version = 11 : i64} {
  func.func @_transe_kernel(%arg0: i32, %arg1: i32, %arg2: memref<128x256xf32, #tpu.memory_space<vmem>>, %arg3: memref<8x128xf32, #tpu.memory_space<vmem>>, %arg4: memref<8x1xf32, #tpu.memory_space<vmem>>, %arg5: memref<8x256xf32, #tpu.memory_space<vmem>>, %arg6: memref<1x256xf32, #tpu.memory_space<vmem>>) attributes {dimension_semantics = [#tpu.dimension_semantics<parallel>, #tpu.dimension_semantics<arbitrary>], iteration_bounds = array<i64: 1, 1>, scalar_prefetch = 0 : i64, scratch_operands = 1 : i64, tpu.core_type = #tpu.core_type<tc>, window_params = [{transform_indices = @transform_0, window_bounds = array<i64: 128, 256>}, {transform_indices = @transform_1, window_bounds = array<i64: 8, 128>}, {transform_indices = @transform_2, window_bounds = array<i64: 8, 1>}, {transform_indices = @transform_3, window_bounds = array<i64: 8, 256>}]} {
    %c0_i32 = arith.constant 0 : i32
    %0 = arith.cmpi eq, %arg1, %c0_i32 : i32
    %1 = arith.extui %0 : i1 to i32
    %c0_i32_0 = arith.constant 0 : i32
    %2 = arith.cmpi ne, %1, %c0_i32_0 : i32
    scf.if %2 {
      %c0_12 = arith.constant 0 : index
      %c0_13 = arith.constant 0 : index
      %18 = vector.load %arg2[%c0_12, %c0_13] : memref<128x256xf32, #tpu.memory_space<vmem>>, vector<128x256xf32>
      %19 = arith.mulf %18, %18 : vector<128x256xf32>
      %cst_14 = arith.constant dense<0.000000e+00> : vector<256xf32>
      %20 = vector.multi_reduction <add>, %19, %cst_14 [0] : vector<128x256xf32> to vector<256xf32>
      %21 = vector.shape_cast %20 : vector<256xf32> to vector<1x256xf32>
      %c0_15 = arith.constant 0 : index
      %c0_16 = arith.constant 0 : index
      %22 = vector.load %arg6[%c0_15, %c0_16] : memref<1x256xf32, #tpu.memory_space<vmem>>, vector<1x256xf32>
      tpu.vector_store %arg6[%c0_15, %c0_16], %21 {strides = array<i32>} : memref<1x256xf32, #tpu.memory_space<vmem>>, vector<1x256xf32>,
    } else {
    }
    %c0 = arith.constant 0 : index
    %c0_1 = arith.constant 0 : index
    %3 = vector.load %arg3[%c0, %c0_1] : memref<8x128xf32, #tpu.memory_space<vmem>>, vector<8x128xf32>
    %c0_2 = arith.constant 0 : index
    %c0_3 = arith.constant 0 : index
    %4 = vector.load %arg2[%c0_2, %c0_3] : memref<128x256xf32, #tpu.memory_space<vmem>>, vector<128x256xf32>
    %cst = arith.constant dense<0.000000e+00> : vector<8x256xf32>
    %5 = tpu.matmul %3, %4, %cst {dimension_numbers = #tpu.dot_dimension_numbers<[1], [0], [0], [1], [0, 0, 1, 1], [], []>} : vector<8x128xf32>, vector<128x256xf32>, vector<8x256xf32> -> vector<8x256xf32>
    %c0_4 = arith.constant 0 : index
    %c0_5 = arith.constant 0 : index
    %6 = vector.load %arg4[%c0_4, %c0_5] : memref<8x1xf32, #tpu.memory_space<vmem>>, vector<8x1xf32>
    %c0_6 = arith.constant 0 : index
    %c0_7 = arith.constant 0 : index
    %7 = vector.load %arg6[%c0_6, %c0_7] : memref<1x256xf32, #tpu.memory_space<vmem>>, vector<1x256xf32>
    %8 = vector.broadcast %6 : vector<8x1xf32> to vector<8x256xf32>
    %9 = vector.broadcast %7 : vector<1x256xf32> to vector<8x256xf32>
    %10 = arith.addf %8, %9 : vector<8x256xf32>
    %cst_8 = arith.constant 2.000000e+00 : f32
    %11 = vector.broadcast %cst_8 : f32 to vector<8x256xf32>
    %12 = arith.mulf %11, %5 : vector<8x256xf32>
    %13 = arith.addf %10, %12 : vector<8x256xf32>
    %cst_9 = arith.constant 0.000000e+00 : f32
    %14 = vector.broadcast %cst_9 : f32 to vector<8x256xf32>
    %15 = arith.maximumf %13, %14 : vector<8x256xf32>
    %16 = math.sqrt %15 : vector<8x256xf32>
    %c0_10 = arith.constant 0 : index
    %c0_11 = arith.constant 0 : index
    %17 = vector.load %arg5[%c0_10, %c0_11] : memref<8x256xf32, #tpu.memory_space<vmem>>, vector<8x256xf32>
    tpu.vector_store %arg5[%c0_10, %c0_11], %16 {strides = array<i32>} : memref<8x256xf32, #tpu.memory_space<vmem>>, vector<8x256xf32>,
    return
  }
  func.func @transform_0(%arg0: i32, %arg1: i32) -> (i32, i32) {
    %c0_i32 = arith.constant 0 : i32
    %c0_i32_0 = arith.constant 0 : i32
    return %c0_i32, %arg0 : i32, i32
  }
  func.func @transform_1(%arg0: i32, %arg1: i32) -> (i32, i32) {
    %c0_i32 = arith.constant 0 : i32
    %c0_i32_0 = arith.constant 0 : i32
    return %arg1, %c0_i32 : i32, i32
  }
  func.func @transform_2(%arg0: i32, %arg1: i32) -> (i32, i32) {
    %c0_i32 = arith.constant 0 : i32
    %c0_i32_0 = arith.constant 0 : i32
    return %arg1, %c0_i32 : i32, i32
  }
  func.func @transform_3(%arg0: i32, %arg1: i32) -> (i32, i32) {
    %c0_i32 = arith.constant 0 : i32
    return %arg1, %arg0 : i32, i32
  }
}

</mosaic_0001>

<bundles_post_ra>
// kernel: transe_forward.1
= control target key start
LH: loop header
LB: loop body
LE: loop exit
PB: predicated region body
PF: predicated region fallthrough
CT: control target
= control target key end

     0   :  { %v373_v7 = vmov 0.0   ;;  %v374_v8 = vmov 0   ;;  %s541_s0 = inlined_call_operand.vmem [shape: f32[128,256], index: 0, kind: input, shape index: {}]   ;;  %s542_s1 = inlined_call_operand.vmem [shape: f32[8,128], index: 1, kind: input, shape index: {}]   ;;  %s543_s2 = inlined_call_operand.vmem [shape: f32[8,1], index: 2, kind: input, shape index: {}]   ;;  %s544_s3 = inlined_call_operand.hbm [shape: f32[8,256], index: 3, kind: output, shape index: {}]  }
   0x1   :  { %v150_v0 = vld [vmem:[%s541_s0 + $0x8] sm:$0xff]  ;;  %v152_v1 = vld [vmem:[%s541_s0 + $0x18] sm:$0xff]  ;;  %v149_v2 = vld [vmem:[%s541_s0] sm:$0xff]  ;;  %245 = vmatprep.mubr.f32.mxu0 %v373_v7  ;;  %344 = vset.pattern.permute.xlu0 %v374_v8 }
   0x2   :  { %v308_v3 = vpack.c.bf16 %v152_v1, %v150_v0  ;;  %v151_v4 = vld [vmem:[%s541_s0 + $0x10] sm:$0xff]  ;;  %v154_v5 = vld [vmem:[%s541_s0 + $0x28] sm:$0xff]  ;;  %v156_v6 = vld [vmem:[%s541_s0 + $0x38] sm:$0xff] }
   0x3   :  { %v310_v9 = vpack.c.bf16 %v151_v4, %v149_v2  ;;  %v312_v10 = vpack.c.bf16 %v156_v6, %v154_v5  ;;  %v153_v11 = vld [vmem:[%s541_s0 + $0x20] sm:$0xff]  ;;  %v155_v12 = vld [vmem:[%s541_s0 + $0x30] sm:$0xff]  ;;  %v158_v13 = vld [vmem:[%s541_s0 + $0x48] sm:$0xff] }
   0x4   :  { %309 = vmatprep.subr.bf16.mxu0 %v308_v3  ;;  %v160_v14 = vld [vmem:[%s541_s0 + $0x58] sm:$0xff]  ;;  %v314_v15 = vpack.c.bf16 %v155_v12, %v153_v11  ;;  %v157_v17 = vld [vmem:[%s541_s0 + $0x40] sm:$0xff]  ;;  %v159_v18 = vld [vmem:[%s541_s0 + $0x50] sm:$0xff] }
   0x5   :  { %311 = vmatpush1.bf16.msra.mxu0 %v310_v9  ;;  %v316_v16 = vpack.c.bf16 %v160_v14, %v158_v13  ;;  %v162_v19 = vld [vmem:[%s541_s0 + $0x68] sm:$0xff]  ;;  %v439_v20 = vld [vmem:[%s541_s0 + $0x78] sm:$0xff]  ;;  %v318_v21 = vpack.c.bf16 %v159_v18, %v157_v17  ;;  %v161_v23 = vld [vmem:[%s541_s0 + $0x60] sm:$0xff] }
   0x6   :  { %313 = vmatprep.subr.bf16.mxu0 %v312_v10  ;;  %v320_v22 = vpack.c.bf16 %v439_v20, %v162_v19  ;;  %v163_v24 = vld [vmem:[%s541_s0 + $0x70] sm:$0xff]  ;;  %v451_v25 = vld [vmem:[%s541_s0 + $0x88] sm:$0xff]  ;;  %v456_v26 = vld [vmem:[%s541_s0 + $0x98] sm:$0xff] }
   0x7   :  { %v252_v27 = vld [vmem:[%s543_s2] sm:$0xff] }
   0x9   :  { %315 = vmatpush1.bf16.msra.mxu0 %v314_v15 }
   0xa   :  { %317 = vmatprep.subr.bf16.mxu0 %v316_v16 }
   0xb   :  { %8 = vsyncpa [#allocation4], 0  ;;  %v322_v28 = vpack.c.bf16 %v163_v24, %v161_v23  ;;  %256 = vperm.xlu0 %344, %v252_v27   ;;  %v324_v29 = vpack.c.bf16 %v456_v26, %v451_v25  ;;  %v165_v30 = vld [vmem:[%s541_s0 + $0x80] sm:$0xff]  ;;  %v167_v31 = vld [vmem:[%s541_s0 + $0x90] sm:$0xff]  ;;  %v51_v34 = vmul.f32 %v149_v2, %v149_v2  ;;  %v52_v35 = vmul.f32 %v150_v0, %v150_v0 }
   0xc   :  { %v472_v32 = vld [vmem:[%s541_s0 + $0xa8] sm:$0xff]  ;;  %v477_v33 = vld [vmem:[%s541_s0 + $0xb8] sm:$0xff]  ;;  %v53_v36 = vmul.f32 %v151_v4, %v151_v4  ;;  %v54_v37 = vmul.f32 %v152_v1, %v152_v1  ;;  %v326_v38 = vpack.c.bf16 %v167_v31, %v165_v30  ;;  %v169_v39 = vld [vmem:[%s541_s0 + $0xa0] sm:$0xff]  ;;  %v55_v44 = vmul.f32 %v153_v11, %v153_v11 }
   0xd   :  { %319 = vmatpush1.bf16.msra.mxu0 %v318_v21  ;;  %v328_v40 = vpack.c.bf16 %v477_v33, %v472_v32  ;;  %v171_v41 = vld [vmem:[%s541_s0 + $0xb0] sm:$0xff]  ;;  %v174_v42 = vld [vmem:[%s541_s0 + $0xc8] sm:$0xff]  ;;  %v493_v43 = vld [vmem:[%s541_s0 + $0xd8] sm:$0xff]  ;;  %v56_v45 = vmul.f32 %v154_v5, %v154_v5  ;;  %v57_v46 = vmul.f32 %v155_v12, %v155_v12  ;;  %v58_v47 = vmul.f32 %v156_v6, %v156_v6 }
   0xe   :  { %321 = vmatprep.subr.bf16.mxu0 %v320_v22  ;;  %v83_v48 = vadd.f32 %v53_v36, %v51_v34  ;;  %v104_v49 = vadd.f32 %v54_v37, %v52_v35  ;;  %v330_v50 = vpack.c.bf16 %v171_v41, %v169_v39  ;;  %v332_v51 = vpack.c.bf16 %v493_v43, %v174_v42  ;;  %v173_v52 = vld [vmem:[%s541_s0 + $0xc0] sm:$0xff]  ;;  %v175_v53 = vld [vmem:[%s541_s0 + $0xd0] sm:$0xff]  ;;  %v178_v54 = vld [vmem:[%s541_s0 + $0xe8] sm:$0xff] }
   0xf   :  { %v180_v55 = vld [vmem:[%s541_s0 + $0xf8] sm:$0xff]  ;;  %v59_v56 = vmul.f32 %v157_v17, %v157_v17  ;;  %v60_v57 = vmul.f32 %v158_v13, %v158_v13  ;;  %v61_v60 = vmul.f32 %v159_v18, %v159_v18  ;;  %v62_v61 = vmul.f32 %v160_v14, %v160_v14  ;;  %v177_v2 = vld [vmem:[%s541_s0 + $0xe0] sm:$0xff]  ;;  %v179_v3 = vld [vmem:[%s541_s0 + $0xf0] sm:$0xff] }
  0x10   :  { %v84_v58 = vadd.f32 %v83_v48, %v55_v44  ;;  %v105_v59 = vadd.f32 %v104_v49, %v56_v45  ;;  %v334_v0 = vpack.c.bf16 %v175_v53, %v173_v52  ;;  %v336_v1 = vpack.c.bf16 %v180_v55, %v178_v54 }
  0x11   :  { %323 = vmatpush1.bf16.msra.mxu0 %v322_v28  ;;  %v63_v4 = vmul.f32 %v161_v23, %v161_v23  ;;  %v64_v5 = vmul.f32 %v162_v19, %v162_v19  ;;  %v65_v8 = vmul.f32 %v163_v24, %v163_v24  ;;  %v66_v9 = vmul.f32 %v439_v20, %v439_v20  ;;  %v148_v20 = vld [vmem:[%s542_s1] sm:$0xff]  ;;  %s376_s1 = smov [#allocation3]  }
  0x12   :  { %325 = vmatprep.subr.bf16.mxu0 %v324_v29  ;;  %v85_v62 = vadd.f32 %v84_v58, %v57_v46  ;;  %v106_v63 = vadd.f32 %v105_v59, %v58_v47  ;;  %v338_v12 = vpack.c.bf16 %v179_v3, %v177_v2  ;;  %v67_v13 = vmul.f32 %v165_v30, %v165_v30  ;;  %s300_s24 = sshll.u32 %s376_s1, 4  ;;  %s301_s24 = int_to_ptr.vmem [resolvable:$true] %s300_s24 }
  0x13   :  { %v68_v14 = vmul.f32 %v451_v25, %v451_v25  ;;  %v69_v17 = vmul.f32 %v167_v31, %v167_v31  ;;  %v70_v18 = vmul.f32 %v456_v26, %v456_v26  ;;  %v71_v22 = vmul.f32 %v169_v39, %v169_v39  ;;  %s349_s25 = scalar_lea.vmem %s301_s24, 256  ;;  %p354_p1 = scmp.lt.s32.totalorder %s301_s24, %s301_s24 }
  0x14   :  { %v86_v6 = vadd.f32 %v85_v62, %v59_v56  ;;  %v107_v7 = vadd.f32 %v106_v63, %v60_v57  ;;  %v72_v23 = vmul.f32 %v472_v32, %v472_v32  ;;  %v73_v25 = vmul.f32 %v171_v41, %v171_v41  ;;  %p350_p0 = scmp.ne.s32.totalorder %s301_s24, %s349_s25  ;;  %p355_p2 = scmp.lt.s32.totalorder %s349_s25, %s349_s25 }
  0x15   :  { %327 = vmatpush1.bf16.msra.mxu0 %v326_v38  ;;  %v74_v28 = vmul.f32 %v477_v33, %v477_v33  ;;  %v75_v30 = vmul.f32 %v173_v52, %v173_v52  ;;  %v76_v31 = vmul.f32 %v174_v42, %v174_v42  ;;  %v77_v36 = vmul.f32 %v175_v53, %v175_v53 }
  0x16   :  { %329 = vmatprep.subr.bf16.mxu0 %v328_v40  ;;  %v87_v10 = vadd.f32 %v86_v6, %v61_v60  ;;  %v108_v11 = vadd.f32 %v107_v7, %v62_v61  ;;  %v78_v37 = vmul.f32 %v493_v43, %v493_v43  ;;  %v79_v32 = vmul.f32 %v177_v2, %v177_v2  ;;  %p356_p3 = por %p355_p2, %p354_p1 }
  0x17   :  { %v80_v40 = vmul.f32 %v178_v54, %v178_v54  ;;  %v81_v41 = vmul.f32 %v179_v3, %v179_v3  ;;  %v82_v46 = vmul.f32 %v180_v55, %v180_v55  ;;  %v375_v57 = vmov 1966171168  }
  0x18   :  { %v88_v15 = vadd.f32 %v87_v10, %v63_v4  ;;  %v109_v16 = vadd.f32 %v108_v11, %v64_v5  ;;  %v129_v43 = vunpack.c.l.s4 %v375_v57  ;;  %v131_v58 = vlaneseq  ;;  %p357_p4 = pnand %p356_p3, %p350_p0 }
  0x19   :  { %331 = vmatpush1.bf16.msra.mxu0 %v330_v50 }
  0x1a   :  { %333 = vmatprep.subr.bf16.mxu0 %v332_v51  ;;  %v89_v19 = vadd.f32 %v88_v15, %v65_v8  ;;  %v110_v21 = vadd.f32 %v109_v16, %v66_v9  ;;  %v130_v62 = vunpack.c.0.s8 %v129_v43  ;;  %v132_v63 = vshrl.u32 %v131_v58, 7 }
  0x1b   :  { %vm145_vm0 = vcmp.lt.s32.totalorder %v131_v58, 256 }
  0x1c   :  { %v90_v24 = vadd.f32 %v89_v19, %v67_v13  ;;  %v111_v27 = vadd.f32 %v110_v21, %v68_v14  ;;  %v133_v3 = vsub.s32 %v130_v62, %v132_v63  ;;  %v262_v7 = vsub.s32 0, %v132_v63 }
  0x1d   :  { %335 = vmatpush1.bf16.msra.mxu0 %v334_v0  ;;  %v266_v9 = vsub.s32 1, %v132_v63 }
  0x1e   :  { %337 = vmatprep.subr.bf16.mxu0 %v336_v1  ;;  %v91_v29 = vadd.f32 %v90_v24, %v69_v17  ;;  %v112_v26 = vadd.f32 %v111_v27, %v70_v18 }
  0x20   :  { %v92_v34 = vadd.f32 %v91_v29, %v71_v22  ;;  %v113_v35 = vadd.f32 %v112_v26, %v72_v23 }
  0x21   :  { %339 = vmatpush1.bf16.msra.mxu0 %v338_v12 }
  0x22   :  { %v93_v38 = vadd.f32 %v92_v34, %v73_v25  ;;  %v114_v39 = vadd.f32 %v113_v35, %v74_v28 }
  0x24   :  { %246 = vmatmul.mubr.f32.vlgmr.msra.gmra.mrb[0].mxu0 %v148_v20  ;;  %v94_v44 = vadd.f32 %v93_v38, %v75_v30  ;;  %v115_v45 = vadd.f32 %v114_v39, %v76_v31 }
  0x26   :  { %v95_v47 = vadd.f32 %v94_v44, %v77_v36  ;;  %v116_v33 = vadd.f32 %v115_v45, %v78_v37 }
  0x28   :  { %v96_v48 = vadd.f32 %v95_v47, %v79_v32  ;;  %v117_v49 = vadd.f32 %v116_v33, %v80_v40 }
  0x2a   :  { %v97_v50 = vadd.f32 %v96_v48, %v81_v41  ;;  %v118_v42 = vadd.f32 %v117_v49, %v82_v46 }
  0x2c   :  { %v98_v51 = vrot.slane %v97_v50, 4  ;;  %v119_v52 = vrot.slane %v118_v42, 4 }
  0x2e   :  { %v99_v53 = vadd.f32 %v98_v51, %v97_v50  ;;  %v120_v56 = vadd.f32 %v119_v52, %v118_v42 }
  0x30   :  { %v100_v59 = vrot.slane %v99_v53, 2  ;;  %v121_v60 = vrot.slane %v120_v56, 2 }
  0x32   :  { %v101_v54 = vadd.f32 %v100_v59, %v99_v53  ;;  %v122_v61 = vadd.f32 %v121_v60, %v120_v56 }
  0x34   :  { %v102_v55 = vrot.slane %v101_v54, 1  ;;  %v123_v0 = vrot.slane %v122_v61, 1 }
  0x36   :  { %v103_v1 = vadd.f32 %v102_v55, %v101_v54  ;;  %v124_v2 = vadd.f32 %v123_v0, %v122_v61 }
  0x38   :  { %v127_v4 = vcombine.low %v103_v1, %v124_v2 }
  0x3a   :  { %v134_v5 = vrot.slane %v127_v4, %v133_v3 }
  0x3c   :  { %v141_v6 = vrot.slane %v134_v5, %v133_v3 }
  0x3e   :  { %147 = vst.msk [vmem:[#allocation2] sm:$0x3] %vm145_vm0, %v141_v6 }
  0x45   :  { %v253_v8 = vld [vmem:[#allocation2] sm:$0x3] }
  0x46   :  { %v263_v10 = vrot.slane %v253_v8, %v262_v7  ;;  %v267_v12 = vrot.slane %v253_v8, %v266_v9 }
  0x8a   :  { %v257_v11 = vpop.permute.xlu0 %256 }
  0x8b   :  { %v270_v13 = vadd.f32 %v263_v10, %v257_v11  ;;  %v271_v14 = vadd.f32 %v267_v12, %v257_v11 }
  0xf7   :  { %v247_v15 = vpop.f32.mrb[0].mxu0 }
  0xf8   :  { %v272_v16 = vmul.f32 2.0, %v247_v15  ;;  %v249_v17 = vpop.f32.mrb[1].mxu0 }
  0xf9   :  { %v273_v18 = vmul.f32 2.0, %v249_v17 }
  0xfa   :  { %v274_v19 = vadd.f32 %v272_v16, %v270_v13 }
  0xfb   :  { %v275_v21 = vadd.f32 %v273_v18, %v271_v14 }
  0xfc   :  { %v276_v20 = vmax.f32 %v274_v19, 0.0 }
  0xfd   :  { %v277_v22 = vmax.f32 %v275_v21, 0.0 }
  0xfe   :  { %345 = vrsqrt.f32 %v276_v20  ;;  %vm280_vm1 = vcmp.eq.f32.partialorder %v276_v20, inf  ;;  %v283_v25 = vand.u32 2147483648, %v276_v20  ;;  %vm282_vm2 = vcmp.eq.f32.partialorder %v276_v20, 0.0 }
  0xff   :  { %347 = vrsqrt.f32 %v277_v22  ;;  %vm287_vm3 = vcmp.eq.f32.partialorder %v277_v22, inf  ;;  %v290_v26 = vand.u32 2147483648, %v277_v22  ;;  %vm289_vm4 = vcmp.eq.f32.partialorder %v277_v22, 0.0 }
 0x108   :  { %v346_v23 = vpop.eup %345 }
 0x109   :  { %v348_v24 = vpop.eup %347  ;;  %v279_v27 = vmul.f32 %v346_v23, %v276_v20 }
 0x10a   :  { %v286_v28 = vmul.f32 %v348_v24, %v277_v22 }
 0x10b   :  { %v281_v29 = vsel %vm280_vm1, %v276_v20, %v279_v27 }
 0x10c   :  { %v284_v30 = vsel %vm282_vm2, %v283_v25, %v281_v29  ;;  %v288_v31 = vsel %vm287_vm3, %v277_v22, %v286_v28 }
 0x10d   :  { %v291_v34 = vsel %vm289_vm4, %v290_v26, %v288_v31  ;;  %292 = vst [vmem:[#allocation3] sm:$0xff] %v284_v30 }
 0x10e   :  { %293 = vst [vmem:[#allocation3 + $0x8] sm:$0xff] %v291_v34 }
 0x10f   :  { %360 = shalt.err (!%p357_p4)
}
 0x110   :  { %s361_s28 = scalar_lea.hbm %s544_s3, 256 }
 0x111   :  { %p362_p5 = scmp.ne.s32.totalorder %s544_s3, %s361_s28  ;;  %p365_p6 = scmp.lt.u32.totalorder %s361_s28, %s544_s3 }
 0x113   :  { %p367_p7 = pnand %p365_p6, %p362_p5 }
 0x115   :  { %370 = shalt.err (!%p367_p7)
}
 0x116   :  { %303 = dma.vmem_to_hbm [thread:$0]  %s301_s24, 256, %s544_s3, [#allocation4]  }
 0x117   :  { %371 = dma.done.wait [#allocation4], 256  }
 0x118   :  { %372 = vsyncadd [#allocation4], 4294967040 }
 0x119   :  { %307 = vsyncpa [#allocation4], 1 }

</bundles_post_ra>
